<compile_context>
chip_gen: v7x
topology: tpu7x:2x2x1
jax: 0.10.0
libtpu: 0.0.40
codegen_flags: <defaults>
</compile_context>

<pallas_src>
import functools

import jax
import jax.numpy as jnp
from jax.experimental import pallas as pl
from jax.experimental.pallas import tpu as pltpu


def _cross_en_tile_diagblock(row_ref, diag_ref, out_ref):
    """One row tile: full-width rows (t, N) plus the (t, t) diagonal sub-block."""
    block = row_ref[...].astype(jnp.float32)                       # (t, N)

    # Numerically stable logsumexp over the full row (lane axis).
    row_max = jnp.max(block, axis=-1, keepdims=True)               # (t, 1)
    sum_exp = jnp.sum(jnp.exp(block - row_max), axis=-1, keepdims=True)
    lse = row_max + jnp.log(sum_exp)                               # (t, 1)

    # Diagonal of this row tile lives entirely inside the (t, t) sub-block.
    d = diag_ref[...].astype(jnp.float32)                          # (t, t)
    r = jax.lax.broadcasted_iota(jnp.int32, d.shape, 0)
    c = jax.lax.broadcasted_iota(jnp.int32, d.shape, 1)
    diag = jnp.sum(jnp.where(r == c, d, jnp.float32(0.0)),
                   axis=-1, keepdims=True)                         # (t, 1)

    partial = jnp.sum(lse - diag)                                  # scalar
    out_ref[...] = jnp.full(out_ref.shape, partial, jnp.float32)   # (8, 128) lane-dense


def _cross_en_tile_masked(row_ref, out_ref, *, tile_rows):
    """Fallback: full-width row tile with an in-block diagonal mask (any tile size)."""
    i = pl.program_id(0)
    block = row_ref[...].astype(jnp.float32)                       # (t, N)

    row_max = jnp.max(block, axis=-1, keepdims=True)
    sum_exp = jnp.sum(jnp.exp(block - row_max), axis=-1, keepdims=True)
    lse = row_max + jnp.log(sum_exp)                               # (t, 1)

    r = jax.lax.broadcasted_iota(jnp.int32, block.shape, 0)
    c = jax.lax.broadcasted_iota(jnp.int32, block.shape, 1)
    diag = jnp.sum(jnp.where(c == r + i * tile_rows, block, jnp.float32(0.0)),
                   axis=-1, keepdims=True)                         # (t, 1)

    partial = jnp.sum(lse - diag)
    out_ref[...] = jnp.full(out_ref.shape, partial, jnp.float32)


def _pick_tile_rows(n, itemsize, budget_bytes):
    """Choose (tile_rows, use_diag_block) under a per-step VMEM byte budget."""
    def bytes_masked(t):
        return t * n * itemsize

    def bytes_diag(t):
        return (t * n + t * t) * itemsize

    # (a) Whole matrix as a single tile: one DMA, zero per-step overhead beyond it.
    if bytes_masked(n) <= budget_bytes:
        return n, False

    # (b) 128-aligned row tiles + tiny (t, t) diagonal-block DMA (cap at 512 rows:
    #     past that the ~0.35us/step overhead is already a small fraction of the DMA).
    best = None
    for t in range(128, min(n, 512) + 1, 128):
        if n % t == 0 and bytes_diag(t) <= budget_bytes:
            best = t
    if best is not None:
        return best, True

    # (c) Awkward N: 8-aligned row tiles, diagonal via full-width mask.
    best = None
    for t in range(8, min(n, 512) + 1, 8):
        if n % t == 0 and bytes_masked(t) <= budget_bytes:
            best = t
    if best is not None:
        return best, False

    # (d) Last resort: single tile even if it blows the budget (vmem_limit is raised
    #     by the caller).
    # TODO(synk): very large prime-ish N may still exceed physical VMEM here.
    return n, False


def cross_en(sim_matrix, *, tile_rows=None, per_buffer_budget_bytes=12 * 1024 * 1024):
    """Pallas equivalent of CrossEn().forward(sim_matrix) -> scalar mean loss."""
    n, m = sim_matrix.shape
    if n != m:
        raise ValueError("CrossEn expects a square similarity matrix")
    itemsize = jnp.dtype(sim_matrix.dtype).itemsize

    if tile_rows is None:
        tile_rows, use_diag_block = _pick_tile_rows(n, itemsize, per_buffer_budget_bytes)
    else:
        if n % tile_rows != 0:
            raise ValueError("row count must be divisible by tile_rows")
        use_diag_block = (tile_rows % 128 == 0) and (tile_rows != n)

    num_tiles = n // tile_rows

    # Per-grid-step input bytes (dominant VMEM consumer; double-buffered by Pallas).
    per_step_bytes = tile_rows * n * itemsize
    if use_diag_block:
        per_step_bytes += tile_rows * tile_rows * itemsize
    vmem_limit = int(min(100 * 2**20, max(32 * 2**20, 3 * per_step_bytes)))

    # Each tile writes its partial sum broadcast into one (8, 128) lane-dense block.
    out_shape = jax.ShapeDtypeStruct((num_tiles * 8, 128), jnp.float32)
    out_spec = pl.BlockSpec((8, 128), lambda i: (i, 0))
    row_spec = pl.BlockSpec((tile_rows, n), lambda i: (i, 0))

    compiler_params = pltpu.CompilerParams(
        dimension_semantics=("parallel",),   # no cross-step state -> megacore-friendly
        vmem_limit_bytes=vmem_limit,
    )

    if use_diag_block:
        diag_spec = pl.BlockSpec((tile_rows, tile_rows), lambda i: (i, i))
        partials = pl.pallas_call(
            _cross_en_tile_diagblock,
            out_shape=out_shape,
            grid_spec=pltpu.PrefetchScalarGridSpec(
                num_scalar_prefetch=0,
                grid=(num_tiles,),
                in_specs=[row_spec, diag_spec],
                out_specs=out_spec,
            ),
            compiler_params=compiler_params,
        )(sim_matrix, sim_matrix)
    else:
        kernel = functools.partial(_cross_en_tile_masked, tile_rows=tile_rows)
        partials = pl.pallas_call(
            kernel,
            out_shape=out_shape,
            grid_spec=pltpu.PrefetchScalarGridSpec(
                num_scalar_prefetch=0,
                grid=(num_tiles,),
                in_specs=[row_spec],
                out_specs=out_spec,
            ),
            compiler_params=compiler_params,
        )(sim_matrix)

    # One partial sum per tile (broadcast across its (8, 128) block); tiny final
    # reduction + mean in plain JAX.
    per_tile = partials[::8, 0]
    return jnp.sum(per_tile) / jnp.float32(n)


def cross_en_ref(sim_matrix):
    """Pure-JAX reference matching the PyTorch module."""
    logpt = jax.nn.log_softmax(sim_matrix.astype(jnp.float32), axis=-1)
    return -jnp.mean(jnp.diagonal(logpt))


if __name__ == "__main__":
    key = jax.random.PRNGKey(0)
    n = 16  # e.g. batch of 16 query/candidate pairs -> (16, 16) similarity matrix
    sim = jax.random.normal(key, (n, n), dtype=jnp.float32) * 3.0

    loss = cross_en(sim)
    loss = jax.block_until_ready(loss)

    ref = cross_en_ref(sim)
    assert jnp.allclose(loss, ref, atol=1e-5, rtol=1e-5), (loss, ref)
    print("KERNEL_OK")
</pallas_src>

<mosaic_0001>
module attributes {stable_mosaic.version = 11 : i64} {
  func.func @_cross_en_tile_masked(%arg0: i32, %arg1: memref<16x16xf32, #tpu.memory_space<vmem>>, %arg2: memref<8x128xf32, #tpu.memory_space<vmem>>) attributes {dimension_semantics = [#tpu.dimension_semantics<parallel>], iteration_bounds = array<i64: 1>, scalar_prefetch = 0 : i64, scratch_operands = 0 : i64, tpu.core_type = #tpu.core_type<tc>, window_params = [{transform_indices = @transform_0, window_bounds = array<i64: 16, 16>}, {transform_indices = @transform_1, window_bounds = array<i64: 8, 128>}]} {
    %c0 = arith.constant 0 : index
    %c0_0 = arith.constant 0 : index
    %0 = vector.load %arg1[%c0, %c0_0] : memref<16x16xf32, #tpu.memory_space<vmem>>, vector<16x16xf32>
    %cst = arith.constant dense<0xFF800000> : vector<16xf32>
    %1 = vector.multi_reduction <maximumf>, %0, %cst [1] : vector<16x16xf32> to vector<16xf32>
    %2 = vector.shape_cast %1 : vector<16xf32> to vector<16x1xf32>
    %3 = vector.broadcast %2 : vector<16x1xf32> to vector<16x16xf32>
    %4 = arith.subf %0, %3 : vector<16x16xf32>
    %5 = math.exp %4 : vector<16x16xf32>
    %cst_1 = arith.constant dense<0.000000e+00> : vector<16xf32>
    %6 = vector.multi_reduction <add>, %5, %cst_1 [1] : vector<16x16xf32> to vector<16xf32>
    %7 = vector.shape_cast %6 : vector<16xf32> to vector<16x1xf32>
    %8 = math.log %7 : vector<16x1xf32>
    %9 = arith.addf %2, %8 : vector<16x1xf32>
    %10 = tpu.iota {dimensions = array<i32: 0>} : vector<16x16xi32>
    %11 = tpu.iota {dimensions = array<i32: 1>} : vector<16x16xi32>
    %c16_i32 = arith.constant 16 : i32
    %12 = arith.muli %arg0, %c16_i32 : i32
    %13 = vector.broadcast %12 : i32 to vector<16x16xi32>
    %14 = arith.addi %10, %13 : vector<16x16xi32>
    %15 = arith.cmpi eq, %11, %14 : vector<16x16xi32>
    %cst_2 = arith.constant 0.000000e+00 : f32
    %16 = vector.broadcast %cst_2 : f32 to vector<16x16xf32>
    %17 = arith.select %15, %0, %16 : vector<16x16xi1>, vector<16x16xf32>
    %cst_3 = arith.constant dense<0.000000e+00> : vector<16xf32>
    %18 = vector.multi_reduction <add>, %17, %cst_3 [1] : vector<16x16xf32> to vector<16xf32>
    %19 = vector.shape_cast %18 : vector<16xf32> to vector<16x1xf32>
    %20 = arith.subf %9, %19 : vector<16x1xf32>
    %21 = vector.shape_cast %20 : vector<16x1xf32> to vector<1x16x1xf32>
    %cst_4 = arith.constant dense<0.000000e+00> : vector<1xf32>
    %22 = vector.multi_reduction <add>, %21, %cst_4 [1, 2] : vector<1x16x1xf32> to vector<1xf32>
    %23 = vector.shape_cast %22 : vector<1xf32> to vector<1x1x1xf32>
    %24 = vector.extract %23[0, 0, 0] : f32 from vector<1x1x1xf32>
    %25 = vector.broadcast %24 : f32 to vector<8x128xf32>
    %c0_5 = arith.constant 0 : index
    %c0_6 = arith.constant 0 : index
    %26 = vector.load %arg2[%c0_5, %c0_6] : memref<8x128xf32, #tpu.memory_space<vmem>>, vector<8x128xf32>
    tpu.vector_store %arg2[%c0_5, %c0_6], %25 {strides = array<i32>} : memref<8x128xf32, #tpu.memory_space<vmem>>, vector<8x128xf32>,
    return
  }
  func.func @transform_0(%arg0: i32) -> (i32, i32) {
    %c0_i32 = arith.constant 0 : i32
    %c0_i32_0 = arith.constant 0 : i32
    return %arg0, %c0_i32 : i32, i32
  }
  func.func @transform_1(%arg0: i32) -> (i32, i32) {
    %c0_i32 = arith.constant 0 : i32
    %c0_i32_0 = arith.constant 0 : i32
    return %arg0, %c0_i32 : i32, i32
  }
}

</mosaic_0001>

<bundles_post_ra>
// kernel: tpu_custom_call.1
= control target key start
LH: loop header
LB: loop body
LE: loop exit
PB: predicated region body
PF: predicated region fallthrough
CT: control target
= control target key end

     0   :  { %6 = vsyncpa [#allocation3], 0  ;;  %s207_s0 = inlined_call_operand.hbm [shape: f32[16,16], index: 0, kind: input, shape index: {}]   ;;  %s208_s1 = inlined_call_operand.hbm [shape: f32[8,128], index: 1, kind: output, shape index: {}]  }
   0x1   :  { %7 = vsyncpa [#allocation4], 0  ;;  %s163_s6 = smov [#allocation2]   ;;  %s115_s10 = scalar_lea.hbm %s207_s0, 256 }
   0x2   :  { %s13_s7 = sshll.u32 %s163_s6, 4  ;;  %p116_p0 = scmp.ne.s32.totalorder %s207_s0, %s115_s10  ;;  %s14_s7 = int_to_ptr.vmem [resolvable:$true] %s13_s7 }
   0x3   :  { %p119_p1 = scmp.lt.u32.totalorder %s115_s10, %s207_s0 }
   0x5   :  { %p121_p2 = pnand %p119_p1, %p116_p0 }
   0x7   :  { %124 = shalt.err (!%p121_p2)
}
   0x8   :  { %s125_s15 = scalar_lea.vmem %s14_s7, 256  ;;  %p130_p4 = scmp.lt.s32.totalorder %s14_s7, %s14_s7 }
   0x9   :  { %p126_p3 = scmp.ne.s32.totalorder %s14_s7, %s125_s15  ;;  %p131_p5 = scmp.lt.s32.totalorder %s125_s15, %s125_s15 }
   0xb   :  { %p132_p6 = por %p131_p5, %p130_p4 }
   0xd   :  { %p133_p7 = pnand %p132_p6, %p126_p3 }
   0xf   :  { %136 = shalt.err (!%p133_p7)
}
  0x10   :  { %s164_s16 = smov 128   ;;  %s165_s17 = smov 8  }
  0x11   :  { %19 = dma.hbm_to_vmem [thread:$0]  %s207_s0, 256, %s14_s7, [#allocation3], %s164_s16, %s164_s16, %s165_s17  }
  0x12   :  { %159 = dma.done.wait [#allocation3], 256  }
  0x13   :  { %160 = vsyncadd [#allocation3], 4294967040  ;;  %vm25_vm0 = vcmask 130048   ;;  %v23_v0 = vld [vmem:[#allocation2] sm:$0xff]  ;;  %v24_v1 = vld [vmem:[#allocation2 + $0x8] sm:$0xff]  ;;  %v50_v4 = vlaneseq  ;;  %vm71_vm3 = vcmask 7168  }
  0x14   :  { %v26_v2 = vsel %vm25_vm0, %v23_v0, -inf  ;;  %v29_v3 = vsel %vm25_vm0, %v24_v1, -inf  ;;  %s166_s0 = smov [#allocation5]  }
  0x15   :  { %27 = vmax.xlane.f32.xlu0 %v26_v2  ;;  %v51_v5 = vshrl.u32 %v50_v4, 7  ;;  %v54_v6 = vand.u32 127, %v50_v4  ;;  %s92_s20 = sshll.u32 %s166_s0, 4  ;;  %s93_s20 = int_to_ptr.vmem [resolvable:$true] %s92_s20 }
  0x16   :  { %s137_s22 = scalar_lea.vmem %s93_s20, 128  ;;  %p142_p9 = scmp.lt.s32.totalorder %s93_s20, %s93_s20 }
  0x17   :  { %vm59_vm1 = vcmp.eq.s32.totalorder %v54_v6, %v51_v5  ;;  %v52_v7 = vadd.s32 8, %v51_v5  ;;  %p138_p8 = scmp.ne.s32.totalorder %s93_s20, %s137_s22  ;;  %p143_p10 = scmp.lt.s32.totalorder %s137_s22, %s137_s22 }
  0x18   :  { %v61_v8 = vsel %vm59_vm1, %v23_v0, 0.0 }
  0x19   :  { %30 = vmax.xlane.f32.xlu0 %v29_v3  ;;  %v63_v9 = vsel %vm25_vm0, %v61_v8, 0.0  ;;  %vm60_vm2 = vcmp.eq.s32.totalorder %v54_v6, %v52_v7  ;;  %p144_p11 = por %p143_p10, %p142_p9 }
  0x1a   :  { %v62_v19 = vsel %vm60_vm2, %v24_v1, 0.0 }
  0x1b   :  { %v66_v21 = vsel %vm25_vm0, %v62_v19, 0.0  ;;  %p145_p12 = pnand %p144_p11, %p138_p8 }
  0x1d   :  { %64 = vadd.xlane.f32.xlu0 %v63_v9 }
  0xa2   :  { %v28_v10 = vpop.xlane.xlu0 %27 }
  0xa3   :  { %v32_v11 = vsub.f32 %v23_v0, %v28_v10 }
  0xa5   :  { %v34_v12 = vmul.f32 1.442695, %v32_v11 }
  0xa6   :  { %v31_v13 = vpop.xlane.xlu0 %30 }
  0xa7   :  { %107 = vpow2.f32 %v34_v12  ;;  %v33_v14 = vsub.f32 %v24_v1, %v31_v13 }
  0xa9   :  { %v36_v15 = vmul.f32 1.442695, %v33_v14 }
  0xaa   :  { %v65_v28 = vpop.xlane.xlu0 %64 }
  0xab   :  { %109 = vpow2.f32 %v36_v15 }
  0xb1   :  { %v108_v16 = vpop.eup %107 }
  0xb2   :  { %v38_v17 = vsel %vm25_vm0, %v108_v16, 0.0 }
  0xb3   :  { %39 = vadd.xlane.f32.xlu1 %v38_v17 }
  0xb5   :  { %v110_v18 = vpop.eup %109 }
  0xb6   :  { %v41_v20 = vsel %vm25_vm0, %v110_v18, 0.0 }
  0xb7   :  { %42 = vadd.xlane.f32.xlu1 %v41_v20 }
  0xbb   :  { %67 = vadd.xlane.f32.xlu1 %v66_v21 }
 0x140   :  { %v40_v22 = vpop.xlane.xlu1 %39 }
 0x141   :  { %111 = vlog2.f32 %v40_v22 }
 0x144   :  { %v43_v23 = vpop.xlane.xlu1 %42 }
 0x145   :  { %113 = vlog2.f32 %v43_v23 }
 0x148   :  { %v68_v30 = vpop.xlane.xlu1 %67 }
 0x14b   :  { %v112_v24 = vpop.eup %111 }
 0x14c   :  { %v45_v25 = vmul.f32 0.6931472, %v112_v24 }
 0x14e   :  { %v48_v26 = vadd.f32 %v45_v25, %v28_v10 }
 0x14f   :  { %v114_v27 = vpop.eup %113 }
 0x150   :  { %v47_v29 = vmul.f32 0.6931472, %v114_v27  ;;  %v69_v31 = vsub.f32 %v48_v26, %v65_v28 }
 0x152   :  { %v49_v32 = vadd.f32 %v47_v29, %v31_v13  ;;  %v72_v34 = vsel %vm71_vm3, %v69_v31, 0.0 }
 0x154   :  { %v70_v33 = vsub.f32 %v49_v32, %v68_v30 }
 0x156   :  { %v73_v35 = vsel %vm71_vm3, %v70_v33, 0.0 }
 0x157   :  { %v74_v36 = vadd.f32 %v73_v35, %v72_v34 }
 0x159   :  { %75 = vadd.xlane.f32.xlu0 %v74_v36 }
 0x1e6   :  { %v76_v37 = vpop.xlane.xlu0 %75 }
 0x1e7   :  { %v77_v38 = vrot.slane %v76_v37, 4 }
 0x1e9   :  { %v78_v39 = vadd.f32 %v77_v38, %v76_v37 }
 0x1eb   :  { %v79_v40 = vrot.slane %v78_v39, 2 }
 0x1ed   :  { %v80_v41 = vadd.f32 %v79_v40, %v78_v39 }
 0x1ef   :  { %v81_v42 = vrot.slane %v80_v41, 1 }
 0x1f1   :  { %v82_v43 = vadd.f32 %v81_v42, %v80_v41 }
 0x1f3   :  { %101 = vpush %v82_v43 }
 0x224   :  { %s102_s21 = spop %101 }
 0x225   :  { %v84_v44 = vstv %s102_s21 }
 0x226   :  { %85 = vst [vmem:[#allocation5] sm:$0xff] %v84_v44 }
 0x227   :  { %148 = shalt.err (!%p145_p12)
}
 0x228   :  { %s149_s25 = scalar_lea.hbm %s208_s1, 128 }
 0x229   :  { %p150_p13 = scmp.ne.s32.totalorder %s208_s1, %s149_s25  ;;  %p153_p0 = scmp.lt.u32.totalorder %s149_s25, %s208_s1 }
 0x22b   :  { %p155_p1 = pnand %p153_p0, %p150_p13 }
 0x22d   :  { %158 = shalt.err (!%p155_p1)
}
 0x22e   :  { %95 = dma.vmem_to_hbm [thread:$0]  %s93_s20, 128, %s208_s1, [#allocation4]  }
 0x22f   :  { %161 = dma.done.wait [#allocation4], 128  }
 0x230   :  { %162 = vsyncadd [#allocation4], 4294967168 }
 0x231   :  { %99 = vsyncpa [#allocation3], 1 }
 0x232   :  { %100 = vsyncpa [#allocation4], 1 }

</bundles_post_ra>
